<compile_context>
chip_gen: v7x
topology: tpu7x:2x2x1
jax: 0.10.0
libtpu: 0.0.40
codegen_flags: <defaults>
</compile_context>

<pallas_src>
import functools

import jax
import jax.numpy as jnp
from jax.experimental import pallas as pl
from jax.experimental.pallas import tpu as pltpu


def _delta_tiled_kernel(x_ref, o_ref, cur_ref, *, order, win_length):
    """Grid = (feature_tile j [parallel], order d [arbitrary]).

    x_ref:   (T, F_TILE) input block (resident across d — index_map ignores d).
    o_ref:   (T, F_TILE) output block at column offset d*F + j*F_TILE (128-aligned).
    cur_ref: (T, F_TILE) f32 scratch holding the previous-order features.
    """
    n = (win_length - 1) // 2
    inv_denom = 3.0 / float(n * (n + 1) * (2 * n + 1))
    T, Fb = x_ref.shape
    d = pl.program_id(1)

    @pl.when(d == 0)
    def _():
        xv = x_ref[...]
        cur_ref[...] = xv.astype(jnp.float32)
        o_ref[...] = xv.astype(o_ref.dtype)

    @pl.when(d > 0)
    def _():
        cur = cur_ref[...]
        # Body: wrap-around rolls (XLU) — correct for all rows except the first/last n.
        acc = jnp.zeros_like(cur)
        for k in range(1, n + 1):
            acc = acc + float(k) * (pltpu.roll(cur, shift=(-k) % T, axis=0)
                                    - pltpu.roll(cur, shift=k % T, axis=0))
        cur_ref[...] = acc * inv_denom

        # Replicate-padding correction: recompute only the first/last n rows from
        # statically clamped row indices (no full-tile selects / broadcasts).
        edge_rows = sorted(set(range(min(n, T))) | set(range(max(T - n, 0), T)))
        for t in edge_rows:
            row = jnp.zeros((1, Fb), jnp.float32)
            for k in range(1, n + 1):
                ip, im = min(t + k, T - 1), max(t - k, 0)
                row = row + float(k) * (cur[ip:ip + 1, :] - cur[im:im + 1, :])
            cur_ref[pl.ds(t, 1), :] = row * inv_denom

        o_ref[...] = cur_ref[...].astype(o_ref.dtype)


def _delta_small_kernel(x_ref, o_ref, *, order, win_length):
    """Fallback for small / non-128-multiple F: single invocation, full arrays.

    Writes the final concatenated (T, (order+1)*F) block in one store (no wrapper
    transpose).  Lanes are independent, so any input padding cannot bleed across F.
    """
    n = (win_length - 1) // 2
    inv_denom = 3.0 / float(n * (n + 1) * (2 * n + 1))
    x = x_ref[...].astype(jnp.float32)
    T, F = x.shape

    # Hoisted once: (T,1) boundary masks reused across both delta passes.
    t_idx = jax.lax.broadcasted_iota(jnp.int32, (T, 1), 0)
    hi = [t_idx >= (T - k) for k in range(1, n + 1)]   # t + k >= T -> clamp to last row
    lo = [t_idx < k for k in range(1, n + 1)]          # t - k < 0  -> clamp to first row

    feats = [x]
    cur = x
    for _ in range(order):
        first = cur[0:1, :]
        last = cur[T - 1:T, :]
        acc = jnp.zeros_like(cur)
        for k in range(1, n + 1):
            plus = jnp.where(hi[k - 1], last, pltpu.roll(cur, shift=(-k) % T, axis=0))
            minus = jnp.where(lo[k - 1], first, pltpu.roll(cur, shift=k % T, axis=0))
            acc = acc + float(k) * (plus - minus)
        cur = acc * inv_denom
        feats.append(cur)

    o_ref[...] = jnp.concatenate(feats, axis=-1).astype(o_ref.dtype)


def _choose_f_blk(T, F, f_tile, elt_bytes, budget_bytes=40 * 1024 * 1024):
    """Largest 128-multiple tile dividing F that fits f_tile and the VMEM budget."""
    # TODO(synk): on v7x prefer >=2 feature tiles (2 TensorCores) when F allows it.
    cands = sorted((b for b in range(128, F + 1, 128) if F % b == 0), reverse=True)

    def footprint(blk):
        # 2x double-buffered in + 2x double-buffered out + f32 scratch + ~6 f32 temps.
        return T * blk * (4 * elt_bytes + 7 * 4)

    for b in cands:
        if b <= f_tile and footprint(b) <= budget_bytes:
            return b
    # TODO(synk): for very long utterances additionally tile T with an order*n-row halo.
    return cands[-1]   # 128 always divides F on this path


def delta(x, order=2, win_length=5, f_tile=512):
    """Pallas equivalent of Delta.forward: (T, F) -> (T, (order+1)*F)."""
    assert x.ndim == 2
    assert win_length >= 3 and win_length % 2 == 1
    assert order >= 1
    assert f_tile >= 128 and f_tile % 128 == 0
    T, F = x.shape
    out_cols = (order + 1) * F
    elt = x.dtype.itemsize
    n = (win_length - 1) // 2

    # Advisory: the op is bandwidth bound — reads T*F, writes (order+1)*T*F.
    cost = pl.CostEstimate(flops=int(order * (4 * n + 1) * T * F),
                           transcendentals=0,
                           bytes_accessed=int(T * F * elt * (order + 2)))

    if F % 128 == 0:
        f_blk = _choose_f_blk(T, F, f_tile, elt)
        num_f = F // f_blk
        footprint = T * f_blk * (4 * elt + 7 * 4)
        vmem_limit = int(min(96 * 2**20, max(32 * 2**20, 2 * footprint)))
        kernel = functools.partial(_delta_tiled_kernel, order=order, win_length=win_length)
        return pl.pallas_call(
            kernel,
            out_shape=jax.ShapeDtypeStruct((T, out_cols), x.dtype),
            grid=(num_f, order + 1),
            in_specs=[pl.BlockSpec((T, f_blk), lambda j, d: (0, j))],
            out_specs=pl.BlockSpec((T, f_blk), lambda j, d: (0, d * num_f + j)),
            scratch_shapes=[pltpu.VMEM((T, f_blk), jnp.float32)],
            compiler_params=pltpu.CompilerParams(
                dimension_semantics=("parallel", "arbitrary"),
                vmem_limit_bytes=vmem_limit),
            cost_estimate=cost,
        )(x)

    # Small / ragged F fallback (e.g. 32/40/80 mel bins): whole arrays in VMEM.
    vmem_limit = int(min(96 * 2**20, max(32 * 2**20, 10 * T * out_cols * 4)))
    kernel = functools.partial(_delta_small_kernel, order=order, win_length=win_length)
    return pl.pallas_call(
        kernel,
        out_shape=jax.ShapeDtypeStruct((T, out_cols), x.dtype),
        grid=(1,),
        in_specs=[pl.BlockSpec((T, F), lambda i: (0, 0))],
        out_specs=pl.BlockSpec((T, out_cols), lambda i: (0, 0)),
        compiler_params=pltpu.CompilerParams(
            dimension_semantics=("arbitrary",),
            vmem_limit_bytes=vmem_limit),
        cost_estimate=cost,
    )(x)


def _delta_ref(x, order=2, win_length=5):
    """Pure-JAX reference mirroring torchaudio.functional.compute_deltas."""
    n = (win_length - 1) // 2
    denom = n * (n + 1) * (2 * n + 1) / 3.0
    T = x.shape[0]
    idx = jnp.arange(T)

    def one(a):
        acc = jnp.zeros_like(a)
        for k in range(1, n + 1):
            plus = a[jnp.clip(idx + k, 0, T - 1)]
            minus = a[jnp.clip(idx - k, 0, T - 1)]
            acc = acc + k * (plus - minus)
        return acc / denom

    feats = [x]
    for _ in range(order):
        feats.append(one(feats[-1]))
    return jnp.concatenate(feats, axis=-1)


if __name__ == "__main__":
    key = jax.random.PRNGKey(0)
    k1, k2, k3 = jax.random.split(key, 3)

    # Case 1: small (time, n_mels)-like shape — fallback path, concatenated in-kernel.
    T1, F1 = 16, 32
    x1 = jax.random.normal(k1, (T1, F1), dtype=jnp.float32)
    out1 = jax.block_until_ready(delta(x1, order=2, win_length=5))
    ref1 = _delta_ref(x1, order=2, win_length=5)
    assert out1.shape == (T1, 3 * F1), out1.shape
    assert jnp.allclose(out1, ref1, atol=1e-5, rtol=1e-5), float(jnp.abs(out1 - ref1).max())

    # Case 2: tiled path — 2 feature tiles of 128 lanes, 3 order steps, direct layout.
    T2, F2 = 64, 256
    x2 = jax.random.normal(k2, (T2, F2), dtype=jnp.float32)
    out2 = jax.block_until_ready(delta(x2, order=2, win_length=5, f_tile=128))
    ref2 = _delta_ref(x2, order=2, win_length=5)
    assert out2.shape == (T2, 3 * F2), out2.shape
    assert jnp.allclose(out2, ref2, atol=1e-5, rtol=1e-5), float(jnp.abs(out2 - ref2).max())

    # Case 3: tiny T on the tiled path — exercises the edge-row (replicate pad) fix.
    T3, F3 = 8, 128
    x3 = jax.random.normal(k3, (T3, F3), dtype=jnp.float32)
    out3 = jax.block_until_ready(delta(x3, order=2, win_length=5))
    ref3 = _delta_ref(x3, order=2, win_length=5)
    assert out3.shape == (T3, 3 * F3), out3.shape
    assert jnp.allclose(out3, ref3, atol=1e-5, rtol=1e-5), float(jnp.abs(out3 - ref3).max())

    print("KERNEL_OK")
</pallas_src>

<mosaic_0001>
module attributes {stable_mosaic.version = 11 : i64} {
  func.func @_delta_small_kernel(%arg0: i32, %arg1: memref<16x32xf32, #tpu.memory_space<vmem>>, %arg2: memref<16x96xf32, #tpu.memory_space<vmem>>) attributes {dimension_semantics = [#tpu.dimension_semantics<arbitrary>], iteration_bounds = array<i64: 1>, scalar_prefetch = 0 : i64, scratch_operands = 0 : i64, tpu.core_type = #tpu.core_type<tc>, window_params = [{pipeline_mode = #tpu.pipeline_mode<synchronous>, transform_indices = @transform_0, window_bounds = array<i64: 16, 32>}, {pipeline_mode = #tpu.pipeline_mode<synchronous>, transform_indices = @transform_1, window_bounds = array<i64: 16, 96>}]} {
    %c0 = arith.constant 0 : index
    %c0_0 = arith.constant 0 : index
    %0 = vector.load %arg1[%c0, %c0_0] : memref<16x32xf32, #tpu.memory_space<vmem>>, vector<16x32xf32>
    %1 = tpu.iota {dimensions = array<i32: 0>} : vector<16x1xi32>
    %c15_i32 = arith.constant 15 : i32
    %2 = vector.broadcast %c15_i32 : i32 to vector<16x1xi32>
    %3 = arith.cmpi sge, %1, %2 : vector<16x1xi32>
    %c14_i32 = arith.constant 14 : i32
    %4 = vector.broadcast %c14_i32 : i32 to vector<16x1xi32>
    %5 = arith.cmpi sge, %1, %4 : vector<16x1xi32>
    %c1_i32 = arith.constant 1 : i32
    %6 = vector.broadcast %c1_i32 : i32 to vector<16x1xi32>
    %7 = arith.cmpi slt, %1, %6 : vector<16x1xi32>
    %c2_i32 = arith.constant 2 : i32
    %8 = vector.broadcast %c2_i32 : i32 to vector<16x1xi32>
    %9 = arith.cmpi slt, %1, %8 : vector<16x1xi32>
    %10 = vector.extract_strided_slice %0 {offsets = [0, 0], sizes = [1, 32], strides = [1, 1]} : vector<16x32xf32> to vector<1x32xf32>
    %11 = vector.extract_strided_slice %0 {offsets = [15, 0], sizes = [1, 32], strides = [1, 1]} : vector<16x32xf32> to vector<1x32xf32>
    %cst = arith.constant 0.000000e+00 : f32
    %12 = vector.broadcast %cst : f32 to vector<16x32xf32>
    %c15_i32_1 = arith.constant 15 : i32
    %13 = tpu.dynamic_rotate %0 by %c15_i32_1 dim 0 : vector<16x32xf32>, i32 -> vector<16x32xf32>
    %14 = vector.shape_cast %3 : vector<16x1xi1> to vector<16x1xi1>
    %15 = vector.broadcast %14 : vector<16x1xi1> to vector<16x32xi1>
    %16 = vector.shape_cast %11 : vector<1x32xf32> to vector<1x32xf32>
    %17 = vector.broadcast %16 : vector<1x32xf32> to vector<16x32xf32>
    %18 = arith.select %15, %17, %13 : vector<16x32xi1>, vector<16x32xf32>
    %c1_i32_2 = arith.constant 1 : i32
    %19 = tpu.dynamic_rotate %0 by %c1_i32_2 dim 0 : vector<16x32xf32>, i32 -> vector<16x32xf32>
    %20 = vector.shape_cast %7 : vector<16x1xi1> to vector<16x1xi1>
    %21 = vector.broadcast %20 : vector<16x1xi1> to vector<16x32xi1>
    %22 = vector.shape_cast %10 : vector<1x32xf32> to vector<1x32xf32>
    %23 = vector.broadcast %22 : vector<1x32xf32> to vector<16x32xf32>
    %24 = arith.select %21, %23, %19 : vector<16x32xi1>, vector<16x32xf32>
    %25 = arith.subf %18, %24 : vector<16x32xf32>
    %cst_3 = arith.constant 1.000000e+00 : f32
    %26 = vector.broadcast %cst_3 : f32 to vector<16x32xf32>
    %27 = arith.mulf %26, %25 : vector<16x32xf32>
    %28 = arith.addf %12, %27 : vector<16x32xf32>
    %c14_i32_4 = arith.constant 14 : i32
    %29 = tpu.dynamic_rotate %0 by %c14_i32_4 dim 0 : vector<16x32xf32>, i32 -> vector<16x32xf32>
    %30 = vector.shape_cast %5 : vector<16x1xi1> to vector<16x1xi1>
    %31 = vector.broadcast %30 : vector<16x1xi1> to vector<16x32xi1>
    %32 = vector.shape_cast %11 : vector<1x32xf32> to vector<1x32xf32>
    %33 = vector.broadcast %32 : vector<1x32xf32> to vector<16x32xf32>
    %34 = arith.select %31, %33, %29 : vector<16x32xi1>, vector<16x32xf32>
    %c2_i32_5 = arith.constant 2 : i32
    %35 = tpu.dynamic_rotate %0 by %c2_i32_5 dim 0 : vector<16x32xf32>, i32 -> vector<16x32xf32>
    %36 = vector.shape_cast %9 : vector<16x1xi1> to vector<16x1xi1>
    %37 = vector.broadcast %36 : vector<16x1xi1> to vector<16x32xi1>
    %38 = vector.shape_cast %10 : vector<1x32xf32> to vector<1x32xf32>
    %39 = vector.broadcast %38 : vector<1x32xf32> to vector<16x32xf32>
    %40 = arith.select %37, %39, %35 : vector<16x32xi1>, vector<16x32xf32>
    %41 = arith.subf %34, %40 : vector<16x32xf32>
    %cst_6 = arith.constant 2.000000e+00 : f32
    %42 = vector.broadcast %cst_6 : f32 to vector<16x32xf32>
    %43 = arith.mulf %42, %41 : vector<16x32xf32>
    %44 = arith.addf %28, %43 : vector<16x32xf32>
    %cst_7 = arith.constant 1.000000e-01 : f32
    %45 = vector.broadcast %cst_7 : f32 to vector<16x32xf32>
    %46 = arith.mulf %44, %45 : vector<16x32xf32>
    %47 = vector.extract_strided_slice %46 {offsets = [0, 0], sizes = [1, 32], strides = [1, 1]} : vector<16x32xf32> to vector<1x32xf32>
    %48 = vector.extract_strided_slice %46 {offsets = [15, 0], sizes = [1, 32], strides = [1, 1]} : vector<16x32xf32> to vector<1x32xf32>
    %cst_8 = arith.constant 0.000000e+00 : f32
    %49 = vector.broadcast %cst_8 : f32 to vector<16x32xf32>
    %c15_i32_9 = arith.constant 15 : i32
    %50 = tpu.dynamic_rotate %46 by %c15_i32_9 dim 0 : vector<16x32xf32>, i32 -> vector<16x32xf32>
    %51 = vector.shape_cast %3 : vector<16x1xi1> to vector<16x1xi1>
    %52 = vector.broadcast %51 : vector<16x1xi1> to vector<16x32xi1>
    %53 = vector.shape_cast %48 : vector<1x32xf32> to vector<1x32xf32>
    %54 = vector.broadcast %53 : vector<1x32xf32> to vector<16x32xf32>
    %55 = arith.select %52, %54, %50 : vector<16x32xi1>, vector<16x32xf32>
    %c1_i32_10 = arith.constant 1 : i32
    %56 = tpu.dynamic_rotate %46 by %c1_i32_10 dim 0 : vector<16x32xf32>, i32 -> vector<16x32xf32>
    %57 = vector.shape_cast %7 : vector<16x1xi1> to vector<16x1xi1>
    %58 = vector.broadcast %57 : vector<16x1xi1> to vector<16x32xi1>
    %59 = vector.shape_cast %47 : vector<1x32xf32> to vector<1x32xf32>
    %60 = vector.broadcast %59 : vector<1x32xf32> to vector<16x32xf32>
    %61 = arith.select %58, %60, %56 : vector<16x32xi1>, vector<16x32xf32>
    %62 = arith.subf %55, %61 : vector<16x32xf32>
    %cst_11 = arith.constant 1.000000e+00 : f32
    %63 = vector.broadcast %cst_11 : f32 to vector<16x32xf32>
    %64 = arith.mulf %63, %62 : vector<16x32xf32>
    %65 = arith.addf %49, %64 : vector<16x32xf32>
    %c14_i32_12 = arith.constant 14 : i32
    %66 = tpu.dynamic_rotate %46 by %c14_i32_12 dim 0 : vector<16x32xf32>, i32 -> vector<16x32xf32>
    %67 = vector.shape_cast %5 : vector<16x1xi1> to vector<16x1xi1>
    %68 = vector.broadcast %67 : vector<16x1xi1> to vector<16x32xi1>
    %69 = vector.shape_cast %48 : vector<1x32xf32> to vector<1x32xf32>
    %70 = vector.broadcast %69 : vector<1x32xf32> to vector<16x32xf32>
    %71 = arith.select %68, %70, %66 : vector<16x32xi1>, vector<16x32xf32>
    %c2_i32_13 = arith.constant 2 : i32
    %72 = tpu.dynamic_rotate %46 by %c2_i32_13 dim 0 : vector<16x32xf32>, i32 -> vector<16x32xf32>
    %73 = vector.shape_cast %9 : vector<16x1xi1> to vector<16x1xi1>
    %74 = vector.broadcast %73 : vector<16x1xi1> to vector<16x32xi1>
    %75 = vector.shape_cast %47 : vector<1x32xf32> to vector<1x32xf32>
    %76 = vector.broadcast %75 : vector<1x32xf32> to vector<16x32xf32>
    %77 = arith.select %74, %76, %72 : vector<16x32xi1>, vector<16x32xf32>
    %78 = arith.subf %71, %77 : vector<16x32xf32>
    %cst_14 = arith.constant 2.000000e+00 : f32
    %79 = vector.broadcast %cst_14 : f32 to vector<16x32xf32>
    %80 = arith.mulf %79, %78 : vector<16x32xf32>
    %81 = arith.addf %65, %80 : vector<16x32xf32>
    %cst_15 = arith.constant 1.000000e-01 : f32
    %82 = vector.broadcast %cst_15 : f32 to vector<16x32xf32>
    %83 = arith.mulf %81, %82 : vector<16x32xf32>
    %84 = tpu.concatenate %0, %46, %83 in 1 : vector<16x32xf32>, vector<16x32xf32>, vector<16x32xf32> -> vector<16x96xf32>
    %c0_16 = arith.constant 0 : index
    %c0_17 = arith.constant 0 : index
    %85 = vector.load %arg2[%c0_16, %c0_17] : memref<16x96xf32, #tpu.memory_space<vmem>>, vector<16x96xf32>
    tpu.vector_store %arg2[%c0_16, %c0_17], %84 {strides = array<i32>} : memref<16x96xf32, #tpu.memory_space<vmem>>, vector<16x96xf32>,
    return
  }
  func.func @transform_0(%arg0: i32) -> (i32, i32) {
    %c0_i32 = arith.constant 0 : i32
    %c0_i32_0 = arith.constant 0 : i32
    %c0_i32_1 = arith.constant 0 : i32
    return %c0_i32, %c0_i32_0 : i32, i32
  }
  func.func @transform_1(%arg0: i32) -> (i32, i32) {
    %c0_i32 = arith.constant 0 : i32
    %c0_i32_0 = arith.constant 0 : i32
    %c0_i32_1 = arith.constant 0 : i32
    return %c0_i32, %c0_i32_0 : i32, i32
  }
}

</mosaic_0001>

<bundles_post_ra>
// kernel: tpu_custom_call.1
= control target key start
LH: loop header
LB: loop body
LE: loop exit
PB: predicated region body
PF: predicated region fallthrough
CT: control target
= control target key end

     0   :  { %6 = vsyncpa [#allocation3], 0  ;;  %s361_s0 = inlined_call_operand.hbm [shape: f32[16,32], index: 0, kind: input, shape index: {}]   ;;  %s362_s1 = inlined_call_operand.hbm [shape: f32[16,96], index: 1, kind: output, shape index: {}]  }
   0x1   :  { %7 = vsyncpa [#allocation4], 0  ;;  %s238_s6 = smov [#allocation2]   ;;  %s190_s10 = scalar_lea.hbm %s361_s0, 256 }
   0x2   :  { %s13_s7 = sshll.u32 %s238_s6, 4  ;;  %p191_p0 = scmp.ne.s32.totalorder %s361_s0, %s190_s10  ;;  %s14_s7 = int_to_ptr.vmem [resolvable:$true] %s13_s7 }
   0x3   :  { %p194_p1 = scmp.lt.u32.totalorder %s190_s10, %s361_s0 }
   0x5   :  { %p196_p2 = pnand %p194_p1, %p191_p0 }
   0x7   :  { %199 = shalt.err (!%p196_p2)
}
   0x8   :  { %s200_s15 = scalar_lea.vmem %s14_s7, 256  ;;  %p205_p4 = scmp.lt.s32.totalorder %s14_s7, %s14_s7 }
   0x9   :  { %p201_p3 = scmp.ne.s32.totalorder %s14_s7, %s200_s15  ;;  %p206_p5 = scmp.lt.s32.totalorder %s200_s15, %s200_s15 }
   0xb   :  { %p207_p6 = por %p206_p5, %p205_p4 }
   0xd   :  { %p208_p7 = pnand %p207_p6, %p201_p3 }
   0xf   :  { %211 = shalt.err (!%p208_p7)
}
  0x10   :  { %s239_s16 = smov 128   ;;  %s240_s17 = smov 8  }
  0x11   :  { %19 = dma.hbm_to_vmem [thread:$0]  %s361_s0, 256, %s14_s7, [#allocation3], %s239_s16, %s239_s16, %s240_s17  }
  0x12   :  { %234 = dma.done.wait [#allocation3], 256  }
  0x13   :  { %235 = vsyncadd [#allocation3], 4294967040  ;;  %v25_v0 = vlaneseq  ;;  %v278_v4 = vld [vmem:[#allocation2] sm:$0xff]  ;;  %v280_v5 = vld [vmem:[#allocation2 + $0x8] sm:$0xff]  ;;  %s241_s0 = smov 32   ;;  %s242_s20 = smov 64  }
  0x14   :  { %v36_v7 = vrot.slane %v278_v4, 1  ;;  %v37_v8 = vrot.slane %v280_v5, 1  ;;  %v51_v9 = vrot.slane %v278_v4, 7  ;;  %v52_v10 = vrot.slane %v280_v5, 7  ;;  %s243_s21 = smov [#allocation5]  }
  0x15   :  { %v269_v1 = vshrl.u32 %v25_v0, 7  ;;  %v69_v12 = vrot.slane %v278_v4, 2  ;;  %v70_v13 = vrot.slane %v280_v5, 2  ;;  %v80_v14 = vrot.slane %v278_v4, 6  ;;  %s172_s22 = sshll.u32 %s243_s21, 4  ;;  %s173_s22 = int_to_ptr.vmem [resolvable:$true] %s172_s22 }
  0x16   :  { %v81_v18 = vrot.slane %v280_v5, 6  ;;  %vm158_vm6 = vcmask 261120   ;;  %vm161_vm7 = vcmask 523264   ;;  %vm164_vm8 = vcmask 785408   ;;  %s212_s23 = scalar_lea.vmem %s173_s22, 256  ;;  %p217_p9 = scmp.lt.s32.totalorder %s173_s22, %s173_s22 }
  0x17   :  { %v61_v2 = vsub.s32 0, %v269_v1  ;;  %v273_v3 = vadd.s32 8, %v269_v1  ;;  %vm32_vm0 = vcmp.lt.s32.totalorder %v269_v1, 1  ;;  %vm34_vm1 = vcmp.lt.s32.totalorder %v269_v1, 2  ;;  %p213_p8 = scmp.ne.s32.totalorder %s173_s22, %s212_s23  ;;  %p218_p10 = scmp.lt.s32.totalorder %s212_s23, %s212_s23 }
  0x18   :  { %vm38_vm2 = vcmp.lt.s32.totalorder %v269_v1, 7  ;;  %vm71_vm3 = vcmp.lt.s32.totalorder %v269_v1, 6  ;;  %v47_v6 = vsub.s32 7, %v269_v1  ;;  %v54_v17 = vsel %vm32_vm0, %v52_v10, %v51_v9 }
  0x19   :  { %vm29_vm4 = vcmp.ge.s32.totalorder %v273_v3, 15  ;;  %vm31_vm5 = vcmp.ge.s32.totalorder %v273_v3, 14  ;;  %v62_v11 = vrot.slane %v278_v4, %v61_v2  ;;  %v39_v15 = vsel %vm38_vm2, %v36_v7, %v37_v8  ;;  %p219_p11 = por %p218_p10, %p217_p9 }
  0x1a   :  { %v40_v16 = vsel %vm38_vm2, %v37_v8, %v36_v7  ;;  %v72_v20 = vsel %vm71_vm3, %v69_v12, %v70_v13  ;;  %v73_v21 = vsel %vm71_vm3, %v70_v13, %v69_v12  ;;  %v48_v22 = vrot.slane %v280_v5, %v47_v6 }
  0x1b   :  { %v63_v19 = vsel %vm32_vm0, %v62_v11, %v54_v17  ;;  %v83_v23 = vsel %vm34_vm1, %v81_v18, %v80_v14  ;;  %v53_v24 = vsel %vm32_vm0, %v51_v9, %v52_v10  ;;  %v82_v25 = vsel %vm34_vm1, %v80_v14, %v81_v18  ;;  %p220_p12 = pnand %p219_p11, %p213_p8 }
  0x1c   :  { %v88_v26 = vsel %vm34_vm1, %v62_v11, %v83_v23  ;;  %v50_v27 = vsel %vm29_vm4, %v48_v22, %v40_v16  ;;  %v79_v28 = vsel %vm31_vm5, %v48_v22, %v73_v21  ;;  %v65_v29 = vsub.f32 %v39_v15, %v63_v19 }
  0x1d   :  { %v90_v30 = vsub.f32 %v72_v20, %v88_v26  ;;  %v66_v31 = vsub.f32 %v50_v27, %v53_v24  ;;  %v91_v32 = vsub.f32 %v79_v28, %v82_v25 }
  0x1f   :  { %v92_v33 = vmul.f32 2.0, %v90_v30  ;;  %v93_v34 = vmul.f32 2.0, %v91_v32 }
  0x21   :  { %v94_v35 = vadd.f32 %v92_v33, %v65_v29  ;;  %v95_v36 = vadd.f32 %v93_v34, %v66_v31 }
  0x23   :  { %v96_v37 = vmul.f32 0.1, %v94_v35  ;;  %v97_v38 = vmul.f32 0.1, %v95_v36 }
  0x25   :  { %144 = vrot.lane.b32.xlu0 %v96_v37, %s241_s0  ;;  %v98_v39 = vrot.slane %v96_v37, 1  ;;  %v99_v40 = vrot.slane %v97_v38, 1  ;;  %v108_v41 = vrot.slane %v96_v37, 7  ;;  %v109_v42 = vrot.slane %v97_v38, 7 }
  0x26   :  { %v115_v43 = vrot.slane %v96_v37, %v61_v2  ;;  %v122_v44 = vrot.slane %v96_v37, 2  ;;  %v123_v45 = vrot.slane %v97_v38, 2  ;;  %v128_v46 = vrot.slane %v96_v37, 6 }
  0x27   :  { %v100_v47 = vsel %vm38_vm2, %v98_v39, %v99_v40  ;;  %v111_v48 = vsel %vm32_vm0, %v109_v42, %v108_v41  ;;  %v129_v49 = vrot.slane %v97_v38, 6  ;;  %v101_v50 = vsel %vm38_vm2, %v99_v40, %v98_v39 }
  0x28   :  { %v116_v51 = vsel %vm32_vm0, %v115_v43, %v111_v48  ;;  %v124_v52 = vsel %vm71_vm3, %v122_v44, %v123_v45  ;;  %v105_v53 = vrot.slane %v97_v38, %v47_v6  ;;  %v110_v54 = vsel %vm32_vm0, %v108_v41, %v109_v42 }
  0x29   :  { %v131_v55 = vsel %vm34_vm1, %v129_v49, %v128_v46  ;;  %146 = vrot.lane.b32.xlu0 %v97_v38, %s241_s0  ;;  %v125_v56 = vsel %vm71_vm3, %v123_v45, %v122_v44  ;;  %v130_v57 = vsel %vm34_vm1, %v128_v46, %v129_v49  ;;  %v118_v61 = vsub.f32 %v100_v47, %v116_v51 }
  0x2a   :  { %v132_v58 = vsel %vm34_vm1, %v115_v43, %v131_v55  ;;  %v107_v59 = vsel %vm29_vm4, %v105_v53, %v101_v50  ;;  %v127_v60 = vsel %vm31_vm5, %v105_v53, %v125_v56 }
  0x2b   :  { %v134_v62 = vsub.f32 %v124_v52, %v132_v58  ;;  %v119_v63 = vsub.f32 %v107_v59, %v110_v54  ;;  %v135_v0 = vsub.f32 %v127_v60, %v130_v57 }
  0x2d   :  { %v136_v2 = vmul.f32 2.0, %v134_v62  ;;  %v137_v6 = vmul.f32 2.0, %v135_v0 }
  0x2f   :  { %v138_v7 = vadd.f32 %v136_v2, %v118_v61  ;;  %v139_v8 = vadd.f32 %v137_v6, %v119_v63 }
  0x31   :  { %v140_v9 = vmul.f32 0.1, %v138_v7  ;;  %v141_v10 = vmul.f32 0.1, %v139_v8 }
  0x33   :  { %152 = vrot.lane.b32.xlu1 %v140_v9, %s242_s20 }
  0x37   :  { %154 = vrot.lane.b32.xlu1 %v141_v10, %s242_s20 }
  0x97   :  { %v145_v1 = vpop.permute.xlu0 %144 }
  0x98   :  { %v159_v11 = vsel %vm158_vm6, %v278_v4, %v145_v1 }
  0x9b   :  { %v147_v3 = vpop.permute.xlu0 %146 }
  0x9c   :  { %v160_v14 = vsel %vm158_vm6, %v280_v5, %v147_v3 }
  0xa5   :  { %v153_v12 = vpop.permute.xlu1 %152 }
  0xa6   :  { %v162_v13 = vsel %vm161_vm7, %v159_v11, %v153_v12 }
  0xa7   :  { %165 = vst.msk [vmem:[#allocation5] sm:$0xff] %vm164_vm8, %v162_v13 }
  0xa9   :  { %v155_v15 = vpop.permute.xlu1 %154 }
  0xaa   :  { %v163_v16 = vsel %vm161_vm7, %v160_v14, %v155_v15 }
  0xab   :  { %166 = vst.msk [vmem:[#allocation5 + $0x8] sm:$0xff] %vm164_vm8, %v163_v16 }
  0xac   :  { %223 = shalt.err (!%p220_p12)
}
  0xad   :  { %s224_s26 = scalar_lea.hbm %s362_s1, 256 }
  0xae   :  { %p225_p13 = scmp.ne.s32.totalorder %s362_s1, %s224_s26  ;;  %p228_p0 = scmp.lt.u32.totalorder %s224_s26, %s362_s1 }
  0xb0   :  { %p230_p1 = pnand %p228_p0, %p225_p13 }
  0xb2   :  { %233 = shalt.err (!%p230_p1)
}
  0xb3   :  { %178 = dma.vmem_to_hbm [thread:$0]  %s173_s22, 256, %s362_s1, [#allocation4], %s239_s16, %s239_s16, %s240_s17  }
  0xb4   :  { %236 = dma.done.wait [#allocation4], 256  }
  0xb5   :  { %237 = vsyncadd [#allocation4], 4294967040 }
  0xb6   :  { %182 = vsyncpa [#allocation3], 1 }
  0xb7   :  { %183 = vsyncpa [#allocation4], 1 }

</bundles_post_ra>
